<compile_context>
chip_gen: v7x
topology: tpu7x:2x2x1
jax: 0.10.0
libtpu: 0.0.40
codegen_flags: <defaults>
</compile_context>

<pallas_src>
import functools

import jax
import jax.numpy as jnp
import numpy as np
from jax import lax
from jax.experimental import pallas as pl
from jax.experimental.pallas import tpu as pltpu

LANE = 128


def _round_up(x, m):
    return ((x + m - 1) // m) * m


def _pick_tile(n):
    # Largest MXU-friendly square A tile that keeps padding waste bounded and,
    # for graphs big enough to matter, leaves >= 2 balanced row tiles so the
    # "parallel" row axis can be sharded across both v7x TensorCores.
    if n >= 2048:
        return 512
    if n >= 512:
        return 256
    return 128


def _vmem_cap_bytes():
    # Per-generation physical VMEM (v5e/v6e: 128 MiB, v7x: 64 MiB per TC).
    try:
        return int(pltpu.get_tpu_info().vmem_capacity_bytes)
    except Exception:
        return 64 * 1024 * 1024  # conservative default (v7x per-TC)


def _vmem_limit(est_bytes):
    cap = int(0.75 * _vmem_cap_bytes())
    return int(min(max(2 * est_bytes, 16 * 1024 * 1024), cap))


# ----------------------------------------------------------------------------
# Kernel 0: row-tiled projection  XW[i] = X[i] @ W   (hoisted out of the A grid)
# ----------------------------------------------------------------------------
def project_kernel(x_ref, w_ref, out_ref):
    out_ref[...] = jnp.dot(x_ref[...], w_ref[...],
                           preferred_element_type=jnp.float32).astype(out_ref.dtype)


# ----------------------------------------------------------------------------
# Kernel 1: conv1 row tile + fused second projection.
#   acc[i]  = sum_k A[i, k] @ XW1[k]                       (k-accumulated)
#   out[i]  = ReLU(acc[i] + b1) @ W2                       (once per row tile)
# XW1 is VMEM-resident (constant index_map); the k-chunk is sliced in-kernel.
# ----------------------------------------------------------------------------
def gcn_layer1_kernel(a_ref, xw_ref, w2_ref, b1_ref, out_ref, acc_ref, *, tk):
    k = pl.program_id(1)

    @pl.when(k == 0)
    def _():
        acc_ref[...] = jnp.zeros_like(acc_ref)

    off = pl.multiple_of(k * tk, tk)
    acc_ref[...] += jnp.dot(a_ref[...], xw_ref[pl.ds(off, tk), :],
                            preferred_element_type=jnp.float32)

    @pl.when(k == pl.num_programs(1) - 1)
    def _():
        h1 = jnp.maximum(acc_ref[...] + b1_ref[...], 0.0)      # bias + ReLU, f32 VPU
        # fused H1 @ W2 (once per row tile): H1 never touches HBM.
        out_ref[...] = jnp.dot(h1.astype(jnp.bfloat16), w2_ref[...],
                               preferred_element_type=jnp.float32).astype(out_ref.dtype)


# ----------------------------------------------------------------------------
# Kernel 2: conv2 + fused global_mean_pool.
#   acc[i]           = sum_k A[i, k] @ H1W2[k]
#   pooled_part[i]   = P[:, i-tile] @ acc[i]               (b2 added in the head)
# ----------------------------------------------------------------------------
def gcn_layer2_pool_kernel(a_ref, hw_ref, p_ref, out_ref, acc_ref, *, tk):
    k = pl.program_id(1)

    @pl.when(k == 0)
    def _():
        acc_ref[...] = jnp.zeros_like(acc_ref)

    off = pl.multiple_of(k * tk, tk)
    acc_ref[...] += jnp.dot(a_ref[...], hw_ref[pl.ds(off, tk), :],
                            preferred_element_type=jnp.float32)

    @pl.when(k == pl.num_programs(1) - 1)
    def _():
        # mean-pool columns for this row tile; dense H2 never materialized in HBM.
        out_ref[0] = jnp.dot(p_ref[...], acc_ref[...],
                             preferred_element_type=jnp.float32)


# ----------------------------------------------------------------------------
# Kernel 3 (tiny): reduce pooled partials, add b2 (P rows sum to 1), FC,
# masked log_softmax over the real classes.
# TODO(synk): block the n_rows reduction if row-tile count ever grows huge.
# ----------------------------------------------------------------------------
def head_kernel(pooled_ref, b2_ref, wfc_ref, bfc_ref, out_ref, *, num_classes):
    pooled = jnp.sum(pooled_ref[...], axis=0) + b2_ref[...]
    logits = jnp.dot(pooled, wfc_ref[...],
                     preferred_element_type=jnp.float32) + bfc_ref[...]
    col = lax.broadcasted_iota(jnp.int32, logits.shape, 1)
    logits = jnp.where(col < num_classes, logits, -1e30)   # mask padded class cols
    m = jnp.max(logits, axis=1, keepdims=True)
    z = logits - m
    lse = jnp.log(jnp.sum(jnp.exp(z), axis=1, keepdims=True))
    out_ref[...] = z - lse


# ------------------------- graph glue (plain JAX) ----------------------------
def build_a_hat_padded(edge_index, num_nodes, n_pad, dtype=jnp.bfloat16):
    # dense adjacency at padded shape, add_self_loops, symmetric normalization
    # (GCNConv semantics); scatter + one fused normalize/cast pass.
    src, dst = edge_index
    a = jnp.zeros((n_pad, n_pad), jnp.float32)
    a = a.at[dst, src].add(1.0)
    diag = jnp.arange(num_nodes)
    a = a.at[diag, diag].add(1.0)
    deg = jnp.sum(a, axis=1)
    dinv = jnp.where(deg > 0, lax.rsqrt(deg), 0.0)
    return (dinv[:, None] * a * dinv[None, :]).astype(dtype)


def build_a_hat_dense(edge_index, num_nodes):
    # f32, unpadded — for the pure-JAX reference only.
    return build_a_hat_padded(edge_index, num_nodes, num_nodes, jnp.float32)


def gcn_forward(x, edge_index, batch, w1, b1, w2, b2, wfc, bfc, *, num_graphs):
    N, F = x.shape
    H = w1.shape[1]
    C = wfc.shape[1]
    G = int(num_graphs)

    tile = _pick_tile(N)
    tm = tk = tile
    n_pad = _round_up(N, tile)
    f_pad = _round_up(F, LANE)
    h_pad = _round_up(H, LANE)
    c_pad = _round_up(C, LANE)
    g_pad = _round_up(max(G, 1), 8)
    n_rows = n_pad // tm
    n_k = n_pad // tk

    def pad2(a, r, c):
        return jnp.pad(a, ((0, r - a.shape[0]), (0, c - a.shape[1])))

    # A_hat built directly at padded shape, normalized + cast to bf16 in one pass.
    a_p = build_a_hat_padded(edge_index, N, n_pad)

    x_p = pad2(x, n_pad, f_pad)                        # f32 projection input
    w1_p = pad2(w1, f_pad, h_pad)                      # f32
    w2_p = pad2(w2, h_pad, h_pad).astype(jnp.bfloat16)
    b1_p = pad2(b1, 1, h_pad)
    b2_p = pad2(b2, 1, h_pad)
    wfc_p = pad2(wfc, h_pad, c_pad)
    bfc_p = pad2(bfc, 1, c_pad)

    # mean-pool matrix P[g, n] = 1/|graph g| (zero on padded nodes / graphs)
    onehot = (batch[None, :] == jnp.arange(g_pad, dtype=batch.dtype)[:, None])
    onehot = onehot.astype(jnp.float32)
    counts = jnp.sum(onehot, axis=1, keepdims=True)
    p_p = pad2(onehot / jnp.maximum(counts, 1.0), g_pad, n_pad)

    bf16, f32 = 2, 4

    # ---- projection: XW1 = X @ W1 (once, row-tiled) --------------------------
    xw1 = pl.pallas_call(
        project_kernel,
        out_shape=jax.ShapeDtypeStruct((n_pad, h_pad), jnp.bfloat16),
        grid_spec=pltpu.PrefetchScalarGridSpec(
            num_scalar_prefetch=0,
            grid=(n_rows,),
            in_specs=[
                pl.BlockSpec((tm, f_pad), lambda i: (i, 0)),
                pl.BlockSpec((f_pad, h_pad), lambda i: (0, 0)),
            ],
            out_specs=pl.BlockSpec((tm, h_pad), lambda i: (i, 0)),
        ),
        compiler_params=pltpu.CompilerParams(
            dimension_semantics=("parallel",)),
    )(x_p, w1_p)

    # ---- conv1 + ReLU + fused (H1 @ W2) --------------------------------------
    lim1 = _vmem_limit(
        2 * tm * tk * bf16            # A tiles (double buffered)
        + 2 * n_pad * h_pad * bf16    # VMEM-resident XW1 (worst-case 2 buffers)
        + 2 * h_pad * h_pad * bf16    # W2
        + 2 * h_pad * f32             # b1
        + 2 * tm * h_pad * bf16       # output tiles
        + tm * h_pad * f32)           # f32 accumulator

    h1w2 = pl.pallas_call(
        functools.partial(gcn_layer1_kernel, tk=tk),
        out_shape=jax.ShapeDtypeStruct((n_pad, h_pad), jnp.bfloat16),
        grid_spec=pltpu.PrefetchScalarGridSpec(
            num_scalar_prefetch=0,
            grid=(n_rows, n_k),
            in_specs=[
                pl.BlockSpec((tm, tk), lambda i, k: (i, k)),
                pl.BlockSpec((n_pad, h_pad), lambda i, k: (0, 0)),  # resident XW1
                pl.BlockSpec((h_pad, h_pad), lambda i, k: (0, 0)),
                pl.BlockSpec((1, h_pad), lambda i, k: (0, 0)),
            ],
            out_specs=pl.BlockSpec((tm, h_pad), lambda i, k: (i, 0)),
            scratch_shapes=[pltpu.VMEM((tm, h_pad), jnp.float32)],
        ),
        compiler_params=pltpu.CompilerParams(
            dimension_semantics=("parallel", "arbitrary"),
            vmem_limit_bytes=lim1),
    )(a_p, xw1, w2_p, b1_p)

    # ---- conv2 + fused global_mean_pool --------------------------------------
    lim2 = _vmem_limit(
        2 * tm * tk * bf16
        + 2 * n_pad * h_pad * bf16    # resident H1W2
        + 2 * g_pad * tm * f32        # P column tiles
        + 2 * g_pad * h_pad * f32     # pooled partial out
        + tm * h_pad * f32)

    pooled_part = pl.pallas_call(
        functools.partial(gcn_layer2_pool_kernel, tk=tk),
        out_shape=jax.ShapeDtypeStruct((n_rows, g_pad, h_pad), jnp.float32),
        grid_spec=pltpu.PrefetchScalarGridSpec(
            num_scalar_prefetch=0,
            grid=(n_rows, n_k),
            in_specs=[
                pl.BlockSpec((tm, tk), lambda i, k: (i, k)),
                pl.BlockSpec((n_pad, h_pad), lambda i, k: (0, 0)),  # resident H1W2
                pl.BlockSpec((g_pad, tm), lambda i, k: (0, i)),
            ],
            out_specs=pl.BlockSpec((1, g_pad, h_pad), lambda i, k: (i, 0, 0)),
            scratch_shapes=[pltpu.VMEM((tm, h_pad), jnp.float32)],
        ),
        compiler_params=pltpu.CompilerParams(
            dimension_semantics=("parallel", "arbitrary"),
            vmem_limit_bytes=lim2),
    )(a_p, h1w2, p_p)

    # ---- reduce + fc + log_softmax (tiny) -------------------------------------
    vm = pl.BlockSpec(memory_space=pltpu.MemorySpace.VMEM)
    out = pl.pallas_call(
        functools.partial(head_kernel, num_classes=C),
        out_shape=jax.ShapeDtypeStruct((g_pad, c_pad), jnp.float32),
        in_specs=[vm] * 4,
        out_specs=vm,
    )(pooled_part, b2_p, wfc_p, bfc_p)

    return out[:G, :C]


def gcn_reference(a_hat, x, w1, b1, w2, b2, wfc, bfc, batch, num_graphs):
    # pure-JAX f32 reference of the original module's forward
    h1 = jnp.maximum(a_hat @ (x @ w1) + b1, 0.0)
    h2 = a_hat @ (h1 @ w2) + b2
    onehot = (batch[None, :] == jnp.arange(num_graphs, dtype=batch.dtype)[:, None])
    onehot = onehot.astype(jnp.float32)
    pool = onehot / jnp.maximum(jnp.sum(onehot, axis=1, keepdims=True), 1.0)
    pooled = pool @ h2
    logits = pooled @ wfc + bfc
    m = jnp.max(logits, axis=1, keepdims=True)
    z = logits - m
    return z - jnp.log(jnp.sum(jnp.exp(z), axis=1, keepdims=True))


if __name__ == "__main__":
    # small deterministic problem
    N = 16              # nodes
    IN_CH = 8           # in_channels
    HID = 16            # hidden_channels
    OUT_CH = 4          # out_channels
    G = 2               # graphs in batch

    key = jax.random.PRNGKey(0)
    k_x, k_w1, k_b1, k_w2, k_b2, k_wfc, k_bfc = jax.random.split(key, 7)

    x = jax.random.normal(k_x, (N, IN_CH), jnp.float32)

    # batch assignment: first 8 nodes -> graph 0, last 8 -> graph 1
    batch = jnp.concatenate([jnp.zeros(8, jnp.int32), jnp.ones(8, jnp.int32)])

    # ring edges within each graph (undirected: both directions)
    edges = []
    for g in range(G):
        base = g * 8
        for i in range(8):
            a, b = base + i, base + (i + 1) % 8
            edges.append((a, b))
            edges.append((b, a))
    edge_index = jnp.asarray(np.array(edges, dtype=np.int32).T)  # [2, E]

    # deterministic parameter init
    w1 = jax.random.normal(k_w1, (IN_CH, HID), jnp.float32) * (1.0 / np.sqrt(IN_CH))
    b1 = jax.random.normal(k_b1, (1, HID), jnp.float32) * 0.01
    w2 = jax.random.normal(k_w2, (HID, HID), jnp.float32) * (1.0 / np.sqrt(HID))
    b2 = jax.random.normal(k_b2, (1, HID), jnp.float32) * 0.01
    wfc = jax.random.normal(k_wfc, (HID, OUT_CH), jnp.float32) * (1.0 / np.sqrt(HID))
    bfc = jax.random.normal(k_bfc, (1, OUT_CH), jnp.float32) * 0.01

    fwd = jax.jit(functools.partial(gcn_forward, num_graphs=G))
    out = jax.block_until_ready(fwd(x, edge_index, batch, w1, b1, w2, b2, wfc, bfc))
    assert out.shape == (G, OUT_CH)

    # sanity 1: log_softmax rows sum (in prob space) to ~1
    probs = np.exp(np.asarray(out)).sum(axis=1)
    assert np.allclose(probs, 1.0, atol=1e-4), probs

    # sanity 2: matches the f32 pure-JAX reference within bf16 MXU tolerance
    a_hat = build_a_hat_dense(edge_index, N)
    ref = np.asarray(gcn_reference(a_hat, x, w1, b1, w2, b2, wfc, bfc, batch, G))
    assert np.allclose(np.asarray(out), ref, atol=5e-2), (np.asarray(out), ref)

    print("KERNEL_OK")
</pallas_src>

<mosaic_0001>
module attributes {stable_mosaic.version = 11 : i64} {
  func.func private @main(%arg0: i32) attributes {dimension_semantics = [#tpu.dimension_semantics<core_parallel>], iteration_bounds = array<i64: 2>, tpu.core_type = #tpu.core_type<sc_scalar_subcore>, window_params = []} {
    return
  }
}

module attributes {stable_mosaic.version = 11 : i64} {
  func.func private @main(%arg0: i32) attributes {dimension_semantics = [#tpu.dimension_semantics<core_parallel>], iteration_bounds = array<i64: 2>, tpu.core_type = #tpu.core_type<sc_scalar_subcore>, window_params = []} {
    return
  }
}

module attributes {stable_mosaic.version = 11 : i64} {
  func.func @project_kernel(%arg0: i32, %arg1: memref<128x128xf32, #tpu.memory_space<vmem>>, %arg2: memref<128x128xf32, #tpu.memory_space<vmem>>, %arg3: memref<128x128xbf16, #tpu.memory_space<vmem>>) attributes {dimension_semantics = [#tpu.dimension_semantics<parallel>], iteration_bounds = array<i64: 1>, scalar_prefetch = 0 : i64, scratch_operands = 0 : i64, tpu.core_type = #tpu.core_type<tc>, window_params = [{transform_indices = @transform_0, window_bounds = array<i64: 128, 128>}, {pipeline_mode = #tpu.pipeline_mode<synchronous>, transform_indices = @transform_1, window_bounds = array<i64: 128, 128>}, {transform_indices = @transform_2, window_bounds = array<i64: 128, 128>}]} {
    %c0 = arith.constant 0 : index
    %c0_0 = arith.constant 0 : index
    %0 = vector.load %arg1[%c0, %c0_0] : memref<128x128xf32, #tpu.memory_space<vmem>>, vector<128x128xf32>
    %c0_1 = arith.constant 0 : index
    %c0_2 = arith.constant 0 : index
    %1 = vector.load %arg2[%c0_1, %c0_2] : memref<128x128xf32, #tpu.memory_space<vmem>>, vector<128x128xf32>
    %cst = arith.constant dense<0.000000e+00> : vector<128x128xf32>
    %2 = tpu.matmul %0, %1, %cst {dimension_numbers = #tpu.dot_dimension_numbers<[1], [0], [0], [1], [0, 0, 1, 1], [], []>} : vector<128x128xf32>, vector<128x128xf32>, vector<128x128xf32> -> vector<128x128xf32>
    %3 = arith.truncf %2 : vector<128x128xf32> to vector<128x128xbf16>
    %c0_3 = arith.constant 0 : index
    %c0_4 = arith.constant 0 : index
    %4 = vector.load %arg3[%c0_3, %c0_4] : memref<128x128xbf16, #tpu.memory_space<vmem>>, vector<128x128xbf16>
    tpu.vector_store %arg3[%c0_3, %c0_4], %3 {strides = array<i32>} : memref<128x128xbf16, #tpu.memory_space<vmem>>, vector<128x128xbf16>,
    return
  }
  func.func @transform_0(%arg0: i32) -> (i32, i32) {
    %c0_i32 = arith.constant 0 : i32
    %c0_i32_0 = arith.constant 0 : i32
    return %arg0, %c0_i32 : i32, i32
  }
  func.func @transform_1(%arg0: i32) -> (i32, i32) {
    %c0_i32 = arith.constant 0 : i32
    %c0_i32_0 = arith.constant 0 : i32
    %c0_i32_1 = arith.constant 0 : i32
    return %c0_i32, %c0_i32_0 : i32, i32
  }
  func.func @transform_2(%arg0: i32) -> (i32, i32) {
    %c0_i32 = arith.constant 0 : i32
    %c0_i32_0 = arith.constant 0 : i32
    return %arg0, %c0_i32 : i32, i32
  }
}

module attributes {stable_mosaic.version = 11 : i64} {
  func.func @gcn_layer1_kernel(%arg0: i32, %arg1: i32, %arg2: memref<128x128xbf16, #tpu.memory_space<vmem>>, %arg3: memref<128x128xbf16, #tpu.memory_space<vmem>>, %arg4: memref<128x128xbf16, #tpu.memory_space<vmem>>, %arg5: memref<1x128xf32, #tpu.memory_space<vmem>>, %arg6: memref<128x128xbf16, #tpu.memory_space<vmem>>, %arg7: memref<128x128xf32, #tpu.memory_space<vmem>>) attributes {dimension_semantics = [#tpu.dimension_semantics<parallel>, #tpu.dimension_semantics<arbitrary>], iteration_bounds = array<i64: 1, 1>, scalar_prefetch = 0 : i64, scratch_operands = 1 : i64, tpu.core_type = #tpu.core_type<tc>, window_params = [{transform_indices = @transform_0, window_bounds = array<i64: 128, 128>}, {pipeline_mode = #tpu.pipeline_mode<synchronous>, transform_indices = @transform_1, window_bounds = array<i64: 128, 128>}, {pipeline_mode = #tpu.pipeline_mode<synchronous>, transform_indices = @transform_2, window_bounds = array<i64: 128, 128>}, {pipeline_mode = #tpu.pipeline_mode<synchronous>, transform_indices = @transform_3, window_bounds = array<i64: 1, 128>}, {transform_indices = @transform_4, window_bounds = array<i64: 128, 128>}]} {
    %c0_i32 = arith.constant 0 : i32
    %0 = arith.cmpi eq, %arg1, %c0_i32 : i32
    %1 = arith.extui %0 : i1 to i32
    %c0_i32_0 = arith.constant 0 : i32
    %2 = arith.cmpi ne, %1, %c0_i32_0 : i32
    scf.if %2 {
      %cst_9 = arith.constant 0.000000e+00 : f32
      %15 = vector.broadcast %cst_9 : f32 to vector<128x128xf32>
      %c0_10 = arith.constant 0 : index
      %c0_11 = arith.constant 0 : index
      %16 = vector.load %arg7[%c0_10, %c0_11] : memref<128x128xf32, #tpu.memory_space<vmem>>, vector<128x128xf32>
      tpu.vector_store %arg7[%c0_10, %c0_11], %15 {strides = array<i32>} : memref<128x128xf32, #tpu.memory_space<vmem>>, vector<128x128xf32>,
    } else {
    }
    %c128_i32 = arith.constant 128 : i32
    %3 = arith.muli %arg1, %c128_i32 : i32
    %4 = tpu.assume_multiple %3, 128 : i32
    %c0 = arith.constant 0 : index
    %c0_1 = arith.constant 0 : index
    %5 = vector.load %arg7[%c0, %c0_1] : memref<128x128xf32, #tpu.memory_space<vmem>>, vector<128x128xf32>
    %c0_2 = arith.constant 0 : index
    %c0_3 = arith.constant 0 : index
    %6 = vector.load %arg2[%c0_2, %c0_3] : memref<128x128xbf16, #tpu.memory_space<vmem>>, vector<128x128xbf16>
    %7 = arith.index_cast %4 : i32 to index
    %c0_4 = arith.constant 0 : index
    %8 = vector.load %arg3[%7, %c0_4] : memref<128x128xbf16, #tpu.memory_space<vmem>>, vector<128x128xbf16>
    %cst = arith.constant dense<0.000000e+00> : vector<128x128xf32>
    %9 = tpu.matmul %6, %8, %cst {dimension_numbers = #tpu.dot_dimension_numbers<[1], [0], [0], [1], [0, 0, 1, 1], [], []>} : vector<128x128xbf16>, vector<128x128xbf16>, vector<128x128xf32> -> vector<128x128xf32>
    %10 = arith.addf %5, %9 : vector<128x128xf32>
    %c0_5 = arith.constant 0 : index
    %c0_6 = arith.constant 0 : index
    %11 = vector.load %arg7[%c0_5, %c0_6] : memref<128x128xf32, #tpu.memory_space<vmem>>, vector<128x128xf32>
    tpu.vector_store %arg7[%c0_5, %c0_6], %10 {strides = array<i32>} : memref<128x128xf32, #tpu.memory_space<vmem>>, vector<128x128xf32>,
    %c0_i32_7 = arith.constant 0 : i32
    %12 = arith.cmpi eq, %arg1, %c0_i32_7 : i32
    %13 = arith.extui %12 : i1 to i32
    %c0_i32_8 = arith.constant 0 : i32
    %14 = arith.cmpi ne, %13, %c0_i32_8 : i32
    scf.if %14 {
      %c0_9 = arith.constant 0 : index
      %c0_10 = arith.constant 0 : index
      %15 = vector.load %arg7[%c0_9, %c0_10] : memref<128x128xf32, #tpu.memory_space<vmem>>, vector<128x128xf32>
      %c0_11 = arith.constant 0 : index
      %c0_12 = arith.constant 0 : index
      %16 = vector.load %arg5[%c0_11, %c0_12] : memref<1x128xf32, #tpu.memory_space<vmem>>, vector<1x128xf32>
      %17 = vector.broadcast %16 : vector<1x128xf32> to vector<128x128xf32>
      %18 = arith.addf %15, %17 : vector<128x128xf32>
      %cst_13 = arith.constant 0.000000e+00 : f32
      %19 = vector.broadcast %cst_13 : f32 to vector<128x128xf32>
      %20 = arith.maximumf %18, %19 : vector<128x128xf32>
      %21 = arith.truncf %20 : vector<128x128xf32> to vector<128x128xbf16>
      %c0_14 = arith.constant 0 : index
      %c0_15 = arith.constant 0 : index
      %22 = vector.load %arg4[%c0_14, %c0_15] : memref<128x128xbf16, #tpu.memory_space<vmem>>, vector<128x128xbf16>
      %cst_16 = arith.constant dense<0.000000e+00> : vector<128x128xf32>
      %23 = tpu.matmul %21, %22, %cst_16 {dimension_numbers = #tpu.dot_dimension_numbers<[1], [0], [0], [1], [0, 0, 1, 1], [], []>} : vector<128x128xbf16>, vector<128x128xbf16>, vector<128x128xf32> -> vector<128x128xf32>
      %24 = arith.truncf %23 : vector<128x128xf32> to vector<128x128xbf16>
      %c0_17 = arith.constant 0 : index
      %c0_18 = arith.constant 0 : index
      %25 = vector.load %arg6[%c0_17, %c0_18] : memref<128x128xbf16, #tpu.memory_space<vmem>>, vector<128x128xbf16>
      tpu.vector_store %arg6[%c0_17, %c0_18], %24 {strides = array<i32>} : memref<128x128xbf16, #tpu.memory_space<vmem>>, vector<128x128xbf16>,
    } else {
    }
    return
  }
  func.func @transform_0(%arg0: i32, %arg1: i32) -> (i32, i32) {
    %c0_i32 = arith.constant 0 : i32
    return %arg0, %arg1 : i32, i32
  }
  func.func @transform_1(%arg0: i32, %arg1: i32) -> (i32, i32) {
    %c0_i32 = arith.constant 0 : i32
    %c0_i32_0 = arith.constant 0 : i32
    %c0_i32_1 = arith.constant 0 : i32
    return %c0_i32, %c0_i32_0 : i32, i32
  }
  func.func @transform_2(%arg0: i32, %arg1: i32) -> (i32, i32) {
    %c0_i32 = arith.constant 0 : i32
    %c0_i32_0 = arith.constant 0 : i32
    %c0_i32_1 = arith.constant 0 : i32
    return %c0_i32, %c0_i32_0 : i32, i32
  }
  func.func @transform_3(%arg0: i32, %arg1: i32) -> (i32, i32) {
    %c0_i32 = arith.constant 0 : i32
    %c0_i32_0 = arith.constant 0 : i32
    %c0_i32_1 = arith.constant 0 : i32
    return %c0_i32, %c0_i32_0 : i32, i32
  }
  func.func @transform_4(%arg0: i32, %arg1: i32) -> (i32, i32) {
    %c0_i32 = arith.constant 0 : i32
    %c0_i32_0 = arith.constant 0 : i32
    return %arg0, %c0_i32 : i32, i32
  }
}

module attributes {stable_mosaic.version = 11 : i64} {
  func.func @head_kernel(%arg0: memref<1x8x128xf32, #tpu.memory_space<vmem>>, %arg1: memref<1x128xf32, #tpu.memory_space<vmem>>, %arg2: memref<128x128xf32, #tpu.memory_space<vmem>>, %arg3: memref<1x128xf32, #tpu.memory_space<vmem>>, %arg4: memref<8x128xf32, #tpu.memory_space<vmem>>) attributes {dimension_semantics = [], scalar_prefetch = 0 : i64, scratch_operands = 0 : i64, tpu.core_type = #tpu.core_type<tc>} {
    %c0 = arith.constant 0 : index
    %c0_0 = arith.constant 0 : index
    %c0_1 = arith.constant 0 : index
    %0 = vector.load %arg0[%c0, %c0_0, %c0_1] : memref<1x8x128xf32, #tpu.memory_space<vmem>>, vector<1x8x128xf32>
    %cst = arith.constant dense<0.000000e+00> : vector<8x128xf32>
    %1 = vector.multi_reduction <add>, %0, %cst [0] : vector<1x8x128xf32> to vector<8x128xf32>
    %c0_2 = arith.constant 0 : index
    %c0_3 = arith.constant 0 : index
    %2 = vector.load %arg1[%c0_2, %c0_3] : memref<1x128xf32, #tpu.memory_space<vmem>>, vector<1x128xf32>
    %3 = vector.broadcast %2 : vector<1x128xf32> to vector<8x128xf32>
    %4 = arith.addf %1, %3 : vector<8x128xf32>
    %c0_4 = arith.constant 0 : index
    %c0_5 = arith.constant 0 : index
    %5 = vector.load %arg2[%c0_4, %c0_5] : memref<128x128xf32, #tpu.memory_space<vmem>>, vector<128x128xf32>
    %cst_6 = arith.constant dense<0.000000e+00> : vector<8x128xf32>
    %6 = tpu.matmul %4, %5, %cst_6 {dimension_numbers = #tpu.dot_dimension_numbers<[1], [0], [0], [1], [0, 0, 1, 1], [], []>} : vector<8x128xf32>, vector<128x128xf32>, vector<8x128xf32> -> vector<8x128xf32>
    %c0_7 = arith.constant 0 : index
    %c0_8 = arith.constant 0 : index
    %7 = vector.load %arg3[%c0_7, %c0_8] : memref<1x128xf32, #tpu.memory_space<vmem>>, vector<1x128xf32>
    %8 = vector.broadcast %7 : vector<1x128xf32> to vector<8x128xf32>
    %9 = arith.addf %6, %8 : vector<8x128xf32>
    %10 = tpu.iota {dimensions = array<i32: 1>} : vector<8x128xi32>
    %c4_i32 = arith.constant 4 : i32
    %11 = vector.broadcast %c4_i32 : i32 to vector<8x128xi32>
    %12 = arith.cmpi slt, %10, %11 : vector<8x128xi32>
    %cst_9 = arith.constant -1.000000e+30 : f32
    %13 = vector.broadcast %cst_9 : f32 to vector<8x128xf32>
    %14 = arith.select %12, %9, %13 : vector<8x128xi1>, vector<8x128xf32>
    %cst_10 = arith.constant dense<0xFF800000> : vector<8xf32>
    %15 = vector.multi_reduction <maximumf>, %14, %cst_10 [1] : vector<8x128xf32> to vector<8xf32>
    %16 = vector.shape_cast %15 : vector<8xf32> to vector<8x1xf32>
    %17 = vector.broadcast %16 : vector<8x1xf32> to vector<8x128xf32>
    %18 = arith.subf %14, %17 : vector<8x128xf32>
    %19 = math.exp %18 : vector<8x128xf32>
    %cst_11 = arith.constant dense<0.000000e+00> : vector<8xf32>
    %20 = vector.multi_reduction <add>, %19, %cst_11 [1] : vector<8x128xf32> to vector<8xf32>
    %21 = vector.shape_cast %20 : vector<8xf32> to vector<8x1xf32>
    %22 = math.log %21 : vector<8x1xf32>
    %23 = vector.broadcast %22 : vector<8x1xf32> to vector<8x128xf32>
    %24 = arith.subf %18, %23 : vector<8x128xf32>
    %c0_12 = arith.constant 0 : index
    %c0_13 = arith.constant 0 : index
    %25 = vector.load %arg4[%c0_12, %c0_13] : memref<8x128xf32, #tpu.memory_space<vmem>>, vector<8x128xf32>
    tpu.vector_store %arg4[%c0_12, %c0_13], %24 {strides = array<i32>} : memref<8x128xf32, #tpu.memory_space<vmem>>, vector<8x128xf32>,
    return
  }
}

module attributes {stable_mosaic.version = 11 : i64} {
  func.func @gcn_layer2_pool_kernel(%arg0: i32, %arg1: i32, %arg2: memref<128x128xbf16, #tpu.memory_space<vmem>>, %arg3: memref<128x128xbf16, #tpu.memory_space<vmem>>, %arg4: memref<8x128xf32, #tpu.memory_space<vmem>>, %arg5: memref<1x8x128xf32, #tpu.memory_space<vmem>>, %arg6: memref<128x128xf32, #tpu.memory_space<vmem>>) attributes {dimension_semantics = [#tpu.dimension_semantics<parallel>, #tpu.dimension_semantics<arbitrary>], iteration_bounds = array<i64: 1, 1>, scalar_prefetch = 0 : i64, scratch_operands = 1 : i64, tpu.core_type = #tpu.core_type<tc>, window_params = [{transform_indices = @transform_0, window_bounds = array<i64: 128, 128>}, {pipeline_mode = #tpu.pipeline_mode<synchronous>, transform_indices = @transform_1, window_bounds = array<i64: 128, 128>}, {transform_indices = @transform_2, window_bounds = array<i64: 8, 128>}, {transform_indices = @transform_3, window_bounds = array<i64: 1, 8, 128>}]} {
    %c0_i32 = arith.constant 0 : i32
    %0 = arith.cmpi eq, %arg1, %c0_i32 : i32
    %1 = arith.extui %0 : i1 to i32
    %c0_i32_0 = arith.constant 0 : i32
    %2 = arith.cmpi ne, %1, %c0_i32_0 : i32
    scf.if %2 {
      %cst_9 = arith.constant 0.000000e+00 : f32
      %15 = vector.broadcast %cst_9 : f32 to vector<128x128xf32>
      %c0_10 = arith.constant 0 : index
      %c0_11 = arith.constant 0 : index
      %16 = vector.load %arg6[%c0_10, %c0_11] : memref<128x128xf32, #tpu.memory_space<vmem>>, vector<128x128xf32>
      tpu.vector_store %arg6[%c0_10, %c0_11], %15 {strides = array<i32>} : memref<128x128xf32, #tpu.memory_space<vmem>>, vector<128x128xf32>,
    } else {
    }
    %c128_i32 = arith.constant 128 : i32
    %3 = arith.muli %arg1, %c128_i32 : i32
    %4 = tpu.assume_multiple %3, 128 : i32
    %c0 = arith.constant 0 : index
    %c0_1 = arith.constant 0 : index
    %5 = vector.load %arg6[%c0, %c0_1] : memref<128x128xf32, #tpu.memory_space<vmem>>, vector<128x128xf32>
    %c0_2 = arith.constant 0 : index
    %c0_3 = arith.constant 0 : index
    %6 = vector.load %arg2[%c0_2, %c0_3] : memref<128x128xbf16, #tpu.memory_space<vmem>>, vector<128x128xbf16>
    %7 = arith.index_cast %4 : i32 to index
    %c0_4 = arith.constant 0 : index
    %8 = vector.load %arg3[%7, %c0_4] : memref<128x128xbf16, #tpu.memory_space<vmem>>, vector<128x128xbf16>
    %cst = arith.constant dense<0.000000e+00> : vector<128x128xf32>
    %9 = tpu.matmul %6, %8, %cst {dimension_numbers = #tpu.dot_dimension_numbers<[1], [0], [0], [1], [0, 0, 1, 1], [], []>} : vector<128x128xbf16>, vector<128x128xbf16>, vector<128x128xf32> -> vector<128x128xf32>
    %10 = arith.addf %5, %9 : vector<128x128xf32>
    %c0_5 = arith.constant 0 : index
    %c0_6 = arith.constant 0 : index
    %11 = vector.load %arg6[%c0_5, %c0_6] : memref<128x128xf32, #tpu.memory_space<vmem>>, vector<128x128xf32>
    tpu.vector_store %arg6[%c0_5, %c0_6], %10 {strides = array<i32>} : memref<128x128xf32, #tpu.memory_space<vmem>>, vector<128x128xf32>,
    %c0_i32_7 = arith.constant 0 : i32
    %12 = arith.cmpi eq, %arg1, %c0_i32_7 : i32
    %13 = arith.extui %12 : i1 to i32
    %c0_i32_8 = arith.constant 0 : i32
    %14 = arith.cmpi ne, %13, %c0_i32_8 : i32
    scf.if %14 {
      %c0_9 = arith.constant 0 : index
      %c0_10 = arith.constant 0 : index
      %15 = vector.load %arg4[%c0_9, %c0_10] : memref<8x128xf32, #tpu.memory_space<vmem>>, vector<8x128xf32>
      %c0_11 = arith.constant 0 : index
      %c0_12 = arith.constant 0 : index
      %16 = vector.load %arg6[%c0_11, %c0_12] : memref<128x128xf32, #tpu.memory_space<vmem>>, vector<128x128xf32>
      %cst_13 = arith.constant dense<0.000000e+00> : vector<8x128xf32>
      %17 = tpu.matmul %15, %16, %cst_13 {dimension_numbers = #tpu.dot_dimension_numbers<[1], [0], [0], [1], [0, 0, 1, 1], [], []>} : vector<8x128xf32>, vector<128x128xf32>, vector<8x128xf32> -> vector<8x128xf32>
      %c0_14 = arith.constant 0 : index
      %c0_15 = arith.constant 0 : index
      %c0_16 = arith.constant 0 : index
      %18 = vector.load %arg5[%c0_14, %c0_15, %c0_16] : memref<1x8x128xf32, #tpu.memory_space<vmem>>, vector<1x8x128xf32>
      %19 = vector.shape_cast %18 : vector<1x8x128xf32> to vector<8x128xf32>
      %20 = vector.shape_cast %17 : vector<8x128xf32> to vector<1x8x128xf32>
      tpu.vector_store %arg5[%c0_14, %c0_15, %c0_16], %20 {strides = array<i32>} : memref<1x8x128xf32, #tpu.memory_space<vmem>>, vector<1x8x128xf32>,
    } else {
    }
    return
  }
  func.func @transform_0(%arg0: i32, %arg1: i32) -> (i32, i32) {
    %c0_i32 = arith.constant 0 : i32
    return %arg0, %arg1 : i32, i32
  }
  func.func @transform_1(%arg0: i32, %arg1: i32) -> (i32, i32) {
    %c0_i32 = arith.constant 0 : i32
    %c0_i32_0 = arith.constant 0 : i32
    %c0_i32_1 = arith.constant 0 : i32
    return %c0_i32, %c0_i32_0 : i32, i32
  }
  func.func @transform_2(%arg0: i32, %arg1: i32) -> (i32, i32) {
    %c0_i32 = arith.constant 0 : i32
    %c0_i32_0 = arith.constant 0 : i32
    return %c0_i32, %arg0 : i32, i32
  }
  func.func @transform_3(%arg0: i32, %arg1: i32) -> (i32, i32, i32) {
    %c0_i32 = arith.constant 0 : i32
    %c0_i32_0 = arith.constant 0 : i32
    %c0_i32_1 = arith.constant 0 : i32
    return %arg0, %c0_i32, %c0_i32_0 : i32, i32, i32
  }
}

</mosaic_0001>

<bundles_post_ra>
// kernel: gcn_forward.4
= control target key start
LH: loop header
LB: loop body
LE: loop exit
PB: predicated region body
PF: predicated region fallthrough
CT: control target
= control target key end

     0   :  { %s622_s1 = inlined_call_operand.vmem [shape: f32[128,128], index: 1, kind: input, shape index: {}]   ;;  %s623_s0 = inlined_call_operand.vmem [shape: f32[128,128], index: 0, kind: input, shape index: {}]   ;;  %s624_s2 = inlined_call_operand.vmem [shape: bf16[128,128], index: 2, kind: output, shape index: {}]  }
   0x1   :  { %v27_v0 = vld [vmem:[%s622_s1] sm:$0xff]  ;;  %v28_v1 = vld [vmem:[%s622_s1 + $0x8] sm:$0xff]  ;;  %v29_v2 = vld [vmem:[%s622_s1 + $0x10] sm:$0xff] }
   0x2   :  { %v439_v3 = vpack.c.bf16 %v28_v1, %v27_v0  ;;  %v30_v4 = vld [vmem:[%s622_s1 + $0x18] sm:$0xff]  ;;  %v31_v6 = vld [vmem:[%s622_s1 + $0x20] sm:$0xff]  ;;  %v32_v7 = vld [vmem:[%s622_s1 + $0x28] sm:$0xff] }
   0x3   :  { %v443_v5 = vpack.c.bf16 %v30_v4, %v29_v2  ;;  %v447_v8 = vpack.c.bf16 %v32_v7, %v31_v6  ;;  %v11_v9 = vld [vmem:[%s623_s0] sm:$0xff]  ;;  %v33_v11 = vld [vmem:[%s622_s1 + $0x30] sm:$0xff]  ;;  %v34_v12 = vld [vmem:[%s622_s1 + $0x38] sm:$0xff] }
   0x4   :  { %440 = vmatprep.subr.bf16.mxu0 %v439_v3  ;;  %471 = vmatprep.subr.bf16.mxu1 %v439_v3  ;;  %v19_v10 = vld [vmem:[%s623_s0 + $0x40] sm:$0xff]  ;;  %v451_v13 = vpack.c.bf16 %v34_v12, %v33_v11  ;;  %v36_v15 = vld [vmem:[%s622_s1 + $0x48] sm:$0xff]  ;;  %v37_v17 = vld [vmem:[%s622_s1 + $0x50] sm:$0xff] }
   0x5   :  { %442 = vmatpush3.bf16.msra.mxu0 %v439_v3  ;;  %479 = vmatpush3.bf16.msra.mxu1 %v439_v3  ;;  %v35_v14 = vld [vmem:[%s622_s1 + $0x40] sm:$0xff]  ;;  %v38_v18 = vld [vmem:[%s622_s1 + $0x58] sm:$0xff]  ;;  %v40_v21 = vld [vmem:[%s622_s1 + $0x68] sm:$0xff] }
   0x6   :  { %444 = vmatprep.subr.bf16.mxu0 %v443_v5  ;;  %472 = vmatprep.subr.bf16.mxu1 %v443_v5  ;;  %v455_v16 = vpack.c.bf16 %v36_v15, %v35_v14  ;;  %v459_v19 = vpack.c.bf16 %v38_v18, %v37_v17  ;;  %v39_v20 = vld [vmem:[%s622_s1 + $0x60] sm:$0xff]  ;;  %v41_v23 = vld [vmem:[%s622_s1 + $0x70] sm:$0xff]  ;;  %v42_v24 = vld [vmem:[%s622_s1 + $0x78] sm:$0xff] }
   0x7   :  { %415 = vmatprep.mubr.f32.mxu0 %v11_v9  ;;  %427 = vmatprep.mubr.f32.mxu1 %v19_v10  ;;  %v463_v22 = vpack.c.bf16 %v40_v21, %v39_v20  ;;  %v467_v25 = vpack.c.bf16 %v42_v24, %v41_v23  ;;  %v12_v26 = vld [vmem:[%s623_s0 + $0x8] sm:$0xff]  ;;  %v13_v28 = vld [vmem:[%s623_s0 + $0x10] sm:$0xff]  ;;  %v14_v30 = vld [vmem:[%s623_s0 + $0x18] sm:$0xff] }
   0x8   :  { %v20_v27 = vld [vmem:[%s623_s0 + $0x48] sm:$0xff]  ;;  %v21_v29 = vld [vmem:[%s623_s0 + $0x50] sm:$0xff]  ;;  %v22_v31 = vld [vmem:[%s623_s0 + $0x58] sm:$0xff] }
   0x9   :  { %446 = vmatpush3.bf16.msra.mxu0 %v443_v5  ;;  %480 = vmatpush3.bf16.msra.mxu1 %v443_v5  ;;  %v15_v32 = vld [vmem:[%s623_s0 + $0x20] sm:$0xff]  ;;  %v16_v34 = vld [vmem:[%s623_s0 + $0x28] sm:$0xff]  ;;  %v17_v36 = vld [vmem:[%s623_s0 + $0x30] sm:$0xff] }
   0xa   :  { %448 = vmatprep.subr.bf16.mxu0 %v447_v8  ;;  %473 = vmatprep.subr.bf16.mxu1 %v447_v8  ;;  %v23_v33 = vld [vmem:[%s623_s0 + $0x60] sm:$0xff]  ;;  %v24_v35 = vld [vmem:[%s623_s0 + $0x68] sm:$0xff]  ;;  %v25_v37 = vld [vmem:[%s623_s0 + $0x70] sm:$0xff] }
   0xb   :  { %v18_v38 = vld [vmem:[%s623_s0 + $0x38] sm:$0xff] }
   0xc   :  { %v26_v39 = vld [vmem:[%s623_s0 + $0x78] sm:$0xff] }
   0xd   :  { %450 = vmatpush3.bf16.msra.mxu0 %v447_v8  ;;  %481 = vmatpush3.bf16.msra.mxu1 %v447_v8 }
   0xe   :  { %452 = vmatprep.subr.bf16.mxu0 %v451_v13  ;;  %474 = vmatprep.subr.bf16.mxu1 %v451_v13 }
  0x11   :  { %454 = vmatpush3.bf16.msra.mxu0 %v451_v13  ;;  %482 = vmatpush3.bf16.msra.mxu1 %v451_v13 }
  0x12   :  { %456 = vmatprep.subr.bf16.mxu0 %v455_v16  ;;  %475 = vmatprep.subr.bf16.mxu1 %v455_v16 }
  0x15   :  { %458 = vmatpush3.bf16.msra.mxu0 %v455_v16  ;;  %483 = vmatpush3.bf16.msra.mxu1 %v455_v16 }
  0x16   :  { %460 = vmatprep.subr.bf16.mxu0 %v459_v19  ;;  %476 = vmatprep.subr.bf16.mxu1 %v459_v19 }
  0x19   :  { %462 = vmatpush3.bf16.msra.mxu0 %v459_v19  ;;  %484 = vmatpush3.bf16.msra.mxu1 %v459_v19 }
  0x1a   :  { %464 = vmatprep.subr.bf16.mxu0 %v463_v22  ;;  %477 = vmatprep.subr.bf16.mxu1 %v463_v22 }
  0x1d   :  { %466 = vmatpush3.bf16.msra.mxu0 %v463_v22  ;;  %485 = vmatpush3.bf16.msra.mxu1 %v463_v22 }
  0x1e   :  { %468 = vmatprep.subr.bf16.mxu0 %v467_v25  ;;  %478 = vmatprep.subr.bf16.mxu1 %v467_v25 }
  0x21   :  { %470 = vmatpush3.bf16.msra.mxu0 %v467_v25  ;;  %486 = vmatpush3.bf16.msra.mxu1 %v467_v25 }
  0x24   :  { %416 = vmatmul.mubr.f32.vlgmr.msra.gmra.mrb[0].mxu0 %v12_v26  ;;  %428 = vmatmul.mubr.f32.vlgmr.msra.gmra.mrb[0].mxu1 %v20_v27 }
  0x25   :  { %418 = vmatprep.mubr.f32.mxu0 %v13_v28  ;;  %430 = vmatprep.mubr.f32.mxu1 %v21_v29 }
  0x28   :  { %419 = vmatmul.mubr.f32.gmra.mrb[2].mxu0 %v14_v30  ;;  %431 = vmatmul.mubr.f32.gmra.mrb[2].mxu1 %v22_v31 }
  0x29   :  { %421 = vmatprep.mubr.f32.mxu0 %v15_v32  ;;  %433 = vmatprep.mubr.f32.mxu1 %v23_v33 }
  0x2c   :  { %422 = vmatmul.mubr.f32.gmra.mrb[4].mxu0 %v16_v34  ;;  %434 = vmatmul.mubr.f32.gmra.mrb[4].mxu1 %v24_v35 }
  0x2d   :  { %424 = vmatprep.mubr.f32.mxu0 %v17_v36  ;;  %436 = vmatprep.mubr.f32.mxu1 %v25_v37 }
  0x30   :  { %425 = vmatmul.mubr.f32.gmra.mrb[6].mxu0 %v18_v38  ;;  %437 = vmatmul.mubr.f32.gmra.mrb[6].mxu1 %v26_v39 }
  0xf7   :  { %v417_v40 = vpop.f32.mrb[0].mxu0  ;;  %v429_v41 = vpop.f32.mrb[0].mxu1 }
  0xf8   :  { %v109_v42 = vpop.f32.mrb[1].mxu0  ;;  %v149_v43 = vpop.f32.mrb[1].mxu1 }
  0xf9   :  { %v307_v44 = vpack.c.bf16 %v417_v40, %v109_v42  ;;  %v327_v45 = vpack.c.bf16 %v429_v41, %v149_v43 }
  0xfb   :  { %308 = vst [vmem:[%s624_s2] sm:$0xff] %v307_v44   ;;  %347 = vst [vmem:[%s624_s2 + $0x20] sm:$0xff] %v327_v45   ;;  %v420_v46 = vpop.f32.mrb[2].mxu0  ;;  %v432_v47 = vpop.f32.mrb[2].mxu1 }
  0xfc   :  { %v119_v48 = vpop.f32.mrb[3].mxu0  ;;  %v159_v49 = vpop.f32.mrb[3].mxu1 }
  0xfd   :  { %v312_v50 = vpack.c.bf16 %v420_v46, %v119_v48  ;;  %v332_v51 = vpack.c.bf16 %v432_v47, %v159_v49 }
  0xff   :  { %344 = vst [vmem:[%s624_s2 + $0x8] sm:$0xff] %v312_v50   ;;  %348 = vst [vmem:[%s624_s2 + $0x28] sm:$0xff] %v332_v51   ;;  %v423_v52 = vpop.f32.mrb[4].mxu0  ;;  %v435_v53 = vpop.f32.mrb[4].mxu1 }
 0x100   :  { %v129_v54 = vpop.f32.mrb[5].mxu0  ;;  %v169_v55 = vpop.f32.mrb[5].mxu1 }
 0x101   :  { %v317_v56 = vpack.c.bf16 %v423_v52, %v129_v54  ;;  %v337_v57 = vpack.c.bf16 %v435_v53, %v169_v55 }
 0x103   :  { %345 = vst [vmem:[%s624_s2 + $0x10] sm:$0xff] %v317_v56   ;;  %349 = vst [vmem:[%s624_s2 + $0x30] sm:$0xff] %v337_v57   ;;  %v426_v58 = vpop.f32.mrb[6].mxu0  ;;  %v438_v59 = vpop.f32.mrb[6].mxu1 }
 0x104   :  { %v139_v60 = vpop.f32.mrb[7].mxu0  ;;  %v179_v61 = vpop.f32.mrb[7].mxu1 }
 0x105   :  { %v322_v62 = vpack.c.bf16 %v426_v58, %v139_v60  ;;  %v342_v63 = vpack.c.bf16 %v438_v59, %v179_v61 }
 0x107   :  { %346 = vst [vmem:[%s624_s2 + $0x18] sm:$0xff] %v322_v62   ;;  %350 = vst [vmem:[%s624_s2 + $0x38] sm:$0xff] %v342_v63  }

// kernel: gcn_forward.5
= control target key start
LH: loop header
LB: loop body
LE: loop exit
PB: predicated region body
PF: predicated region fallthrough
CT: control target
= control target key end

     0   :  { %s977_s1 = inlined_call_operand.vmem [shape: bf16[128,128], index: 1, kind: input, shape index: {}]   ;;  %s978_s0 = inlined_call_operand.vmem [shape: bf16[128,128], index: 0, kind: input, shape index: {}]   ;;  %s979_s2 = inlined_call_operand.vmem [shape: bf16[128,128], index: 2, kind: input, shape index: {}]   ;;  %s980_s3 = inlined_call_operand.vmem [shape: f32[1,128], index: 3, kind: input, shape index: {}]   ;;  %s981_s4 = inlined_call_operand.vmem [shape: bf16[128,128], index: 4, kind: output, shape index: {}]  }
   0x1   :  { %v829_v0 = vld [vmem:[%s977_s1] sm:$0xff]   ;;  %v830_v1 = vld [vmem:[%s977_s1 + $0x8] sm:$0xff]   ;;  %v831_v2 = vld [vmem:[%s977_s1 + $0x10] sm:$0xff]  }
   0x2   :  { %765 = vmatprep.subr.bf16.mxu0 %v829_v0  ;;  %v832_v3 = vld [vmem:[%s977_s1 + $0x18] sm:$0xff]   ;;  %v837_v4 = vld [vmem:[%s978_s0] sm:$0xff]   ;;  %v834_v6 = vld [vmem:[%s977_s1 + $0x28] sm:$0xff]  }
   0x3   :  { %766 = vmatpush3.bf16.msra.mxu0 %v829_v0  ;;  %781 = vmatprep.mubr.bf16.mxu0 %v837_v4  ;;  %v833_v5 = vld [vmem:[%s977_s1 + $0x20] sm:$0xff]   ;;  %v846_v8 = vld [vmem:[%s979_s2 + $0x8] sm:$0xff]   ;;  %v835_v9 = vld [vmem:[%s977_s1 + $0x30] sm:$0xff]  }
   0x4   :  { %767 = vmatprep.subr.bf16.mxu0 %v830_v1  ;;  %v845_v7 = vld [vmem:[%s979_s2] sm:$0xff]   ;;  %v847_v10 = vld [vmem:[%s979_s2 + $0x10] sm:$0xff]   ;;  %v836_v11 = vld [vmem:[%s977_s1 + $0x38] sm:$0xff]  }
   0x5   :  { %797 = vmatprep.subr.bf16.mxu1 %v845_v7  ;;  %v848_v12 = vld [vmem:[%s979_s2 + $0x18] sm:$0xff]   ;;  %v849_v13 = vld [vmem:[%s979_s2 + $0x20] sm:$0xff]   ;;  %v838_v14 = vld [vmem:[%s978_s0 + $0x8] sm:$0xff]  }
   0x6   :  { %798 = vmatpush3.bf16.msra.mxu1 %v845_v7  ;;  %v839_v15 = vld [vmem:[%s978_s0 + $0x10] sm:$0xff]   ;;  %v850_v16 = vld [vmem:[%s979_s2 + $0x28] sm:$0xff]   ;;  %v840_v17 = vld [vmem:[%s978_s0 + $0x18] sm:$0xff]  }
   0x7   :  { %768 = vmatpush3.bf16.msra.mxu0 %v830_v1  ;;  %799 = vmatprep.subr.bf16.mxu1 %v846_v8  ;;  %v841_v18 = vld [vmem:[%s978_s0 + $0x20] sm:$0xff]   ;;  %v842_v19 = vld [vmem:[%s978_s0 + $0x28] sm:$0xff]   ;;  %v843_v20 = vld [vmem:[%s978_s0 + $0x30] sm:$0xff]  }
   0x8   :  { %769 = vmatprep.subr.bf16.mxu0 %v831_v2  ;;  %v844_v21 = vld [vmem:[%s978_s0 + $0x38] sm:$0xff]   ;;  %v851_v22 = vld [vmem:[%s979_s2 + $0x30] sm:$0xff]   ;;  %v645_v24 = vld [vmem:[%s980_s3] ss:$0 sm:$0xff] }
   0x9   :  { %v852_v23 = vld [vmem:[%s979_s2 + $0x38] sm:$0xff]  }
   0xa   :  { %800 = vmatpush3.bf16.msra.mxu1 %v846_v8 }
   0xb   :  { %770 = vmatpush3.bf16.msra.mxu0 %v831_v2  ;;  %801 = vmatprep.subr.bf16.mxu1 %v847_v10 }
   0xc   :  { %771 = vmatprep.subr.bf16.mxu0 %v832_v3 }
   0xe   :  { %802 = vmatpush3.bf16.msra.mxu1 %v847_v10 }
   0xf   :  { %772 = vmatpush3.bf16.msra.mxu0 %v832_v3  ;;  %803 = vmatprep.subr.bf16.mxu1 %v848_v12 }
  0x10   :  { %773 = vmatprep.subr.bf16.mxu0 %v833_v5 }
  0x12   :  { %804 = vmatpush3.bf16.msra.mxu1 %v848_v12 }
  0x13   :  { %774 = vmatpush3.bf16.msra.mxu0 %v833_v5  ;;  %805 = vmatprep.subr.bf16.mxu1 %v849_v13 }
  0x14   :  { %775 = vmatprep.subr.bf16.mxu0 %v834_v6 }
  0x16   :  { %806 = vmatpush3.bf16.msra.mxu1 %v849_v13 }
  0x17   :  { %776 = vmatpush3.bf16.msra.mxu0 %v834_v6  ;;  %807 = vmatprep.subr.bf16.mxu1 %v850_v16 }
  0x18   :  { %777 = vmatprep.subr.bf16.mxu0 %v835_v9 }
  0x1a   :  { %808 = vmatpush3.bf16.msra.mxu1 %v850_v16 }
  0x1b   :  { %778 = vmatpush3.bf16.msra.mxu0 %v835_v9  ;;  %809 = vmatprep.subr.bf16.mxu1 %v851_v22 }
  0x1c   :  { %779 = vmatprep.subr.bf16.mxu0 %v836_v11 }
  0x1e   :  { %810 = vmatpush3.bf16.msra.mxu1 %v851_v22 }
  0x1f   :  { %780 = vmatpush3.bf16.msra.mxu0 %v836_v11  ;;  %811 = vmatprep.subr.bf16.mxu1 %v852_v23 }
  0x22   :  { %782 = vmatmul.mubr.bf16.vlgmr.msra.gmra.mrb[0].mxu0 %v838_v14  ;;  %812 = vmatpush3.bf16.msra.mxu1 %v852_v23 }
  0x23   :  { %785 = vmatprep.mubr.bf16.mxu0 %v839_v15 }
  0x2a   :  { %786 = vmatmul.mubr.bf16.gmra.mrb[4].mxu0 %v840_v17 }
  0x2b   :  { %789 = vmatprep.mubr.bf16.mxu0 %v841_v18 }
  0x32   :  { %790 = vmatmul.mubr.bf16.gmra.mrb[8].mxu0 %v842_v19 }
  0x33   :  { %793 = vmatprep.mubr.bf16.mxu0 %v843_v20 }
  0x3a   :  { %794 = vmatmul.mubr.bf16.gmra.mrb[12].mxu0 %v844_v21 }
  0xf5   :  { %v783_v25 = vpop.f32.mrb[0].mxu0 }
  0xf6   :  { %v344_v26 = vadd.f32 %v783_v25, %v645_v24  ;;  %v221_v27 = vpop.f32.mrb[1].mxu0 }
  0xf7   :  { %v342_v28 = vadd.f32 %v645_v24, %v221_v27  ;;  %v784_v29 = vpop.f32.mrb[2].mxu0 }
  0xf8   :  { %v345_v30 = vadd.f32 %v784_v29, %v645_v24  ;;  %v224_v31 = vpop.f32.mrb[3].mxu0  ;;  %v360_v33 = vmax.f32 %v344_v26, 0.0 }
  0xf9   :  { %v343_v32 = vadd.f32 %v645_v24, %v224_v31  ;;  %v358_v35 = vmax.f32 %v342_v28, 0.0 }
  0xfa   :  { %v361_v34 = vmax.f32 %v345_v30, 0.0 }
  0xfb   :  { %v359_v36 = vmax.f32 %v343_v32, 0.0 }
  0xfc   :  { %v375_v37 = vpack.c.bf16 %v361_v34, %v360_v33 }
  0xfd   :  { %v787_v38 = vpop.f32.mrb[4].mxu0  ;;  %v374_v39 = vpack.c.bf16 %v359_v36, %v358_v35 }
  0xfe   :  { %v348_v40 = vadd.f32 %v787_v38, %v645_v24  ;;  %v237_v41 = vpop.f32.mrb[5].mxu0 }
  0xff   :  { %v346_v42 = vadd.f32 %v645_v24, %v237_v41  ;;  %v788_v43 = vpop.f32.mrb[6].mxu0  ;;  %813 = vmatprep.mubr.bf16.mxu1 %v374_v39 }
 0x100   :  { %v349_v44 = vadd.f32 %v788_v43, %v645_v24  ;;  %v240_v45 = vpop.f32.mrb[7].mxu0  ;;  %814 = vmatmul.mubr.bf16.vlgmr.msra.gmra.mrb[0].mxu1 %v375_v37  ;;  %v364_v47 = vmax.f32 %v348_v40, 0.0 }
 0x101   :  { %v347_v46 = vadd.f32 %v645_v24, %v240_v45  ;;  %v362_v49 = vmax.f32 %v346_v42, 0.0 }
 0x102   :  { %v365_v48 = vmax.f32 %v349_v44, 0.0 }
 0x103   :  { %v363_v50 = vmax.f32 %v347_v46, 0.0 }
 0x104   :  { %v377_v51 = vpack.c.bf16 %v365_v48, %v364_v47 }
 0x105   :  { %v376_v52 = vpack.c.bf16 %v363_v50, %v362_v49  ;;  %v791_v53 = vpop.f32.mrb[8].mxu0 }
 0x106   :  { %v352_v54 = vadd.f32 %v791_v53, %v645_v24  ;;  %v253_v55 = vpop.f32.mrb[9].mxu0 }
 0x107   :  { %v350_v56 = vadd.f32 %v645_v24, %v253_v55  ;;  %v792_v57 = vpop.f32.mrb[10].mxu0  ;;  %817 = vmatprep.mubr.bf16.mxu1 %v376_v52 }
 0x108   :  { %v353_v58 = vadd.f32 %v792_v57, %v645_v24  ;;  %v256_v59 = vpop.f32.mrb[11].mxu0  ;;  %818 = vmatmul.mubr.bf16.gmra.mrb[4].mxu1 %v377_v51  ;;  %v368_v61 = vmax.f32 %v352_v54, 0.0 }
 0x109   :  { %v351_v60 = vadd.f32 %v645_v24, %v256_v59  ;;  %v366_v63 = vmax.f32 %v350_v56, 0.0 }
 0x10a   :  { %v369_v62 = vmax.f32 %v353_v58, 0.0 }
 0x10b   :  { %v367_v0 = vmax.f32 %v351_v60, 0.0 }
 0x10c   :  { %v379_v1 = vpack.c.bf16 %v369_v62, %v368_v61 }
 0x10d   :  { %v378_v2 = vpack.c.bf16 %v367_v0, %v366_v63  ;;  %v795_v3 = vpop.f32.mrb[12].mxu0 }
 0x10e   :  { %v356_v4 = vadd.f32 %v795_v3, %v645_v24  ;;  %v269_v5 = vpop.f32.mrb[13].mxu0 }
 0x10f   :  { %v354_v6 = vadd.f32 %v645_v24, %v269_v5  ;;  %v796_v7 = vpop.f32.mrb[14].mxu0  ;;  %821 = vmatprep.mubr.bf16.mxu1 %v378_v2 }
 0x110   :  { %v357_v8 = vadd.f32 %v796_v7, %v645_v24  ;;  %v272_v9 = vpop.f32.mrb[15].mxu0  ;;  %822 = vmatmul.mubr.bf16.gmra.mrb[8].mxu1 %v379_v1  ;;  %v372_v11 = vmax.f32 %v356_v4, 0.0 }
 0x111   :  { %v355_v10 = vadd.f32 %v645_v24, %v272_v9  ;;  %v370_v13 = vmax.f32 %v354_v6, 0.0 }
 0x112   :  { %v373_v12 = vmax.f32 %v357_v8, 0.0 }
 0x113   :  { %v371_v14 = vmax.f32 %v355_v10, 0.0 }
 0x114   :  { %v381_v15 = vpack.c.bf16 %v373_v12, %v372_v11 }
 0x115   :  { %v380_v16 = vpack.c.bf16 %v371_v14, %v370_v13 }
 0x117   :  { %825 = vmatprep.mubr.bf16.mxu1 %v380_v16 }
 0x118   :  { %826 = vmatmul.mubr.bf16.gmra.mrb[12].mxu1 %v381_v15 }
 0x1d3   :  { %v815_v17 = vpop.f32.mrb[0].mxu1 }
 0x1d4   :  { %v480_v18 = vpop.f32.mrb[1].mxu1 }
 0x1d5   :  { %v816_v19 = vpop.f32.mrb[2].mxu1 }
 0x1d6   :  { %v694_v20 = vpack.c.bf16 %v816_v19, %v815_v17  ;;  %v483_v21 = vpop.f32.mrb[3].mxu1 }
 0x1d7   :  { %v689_v22 = vpack.c.bf16 %v483_v21, %v480_v18 }
 0x1d8   :  { %726 = vst [vmem:[%s981_s4 + $0x8] sm:$0xff] %v694_v20  }
 0x1d9   :  { %690 = vst [vmem:[%s981_s4] sm:$0xff] %v689_v22  }
 0x1db   :  { %v819_v23 = vpop.f32.mrb[4].mxu1 }
 0x1dc   :  { %v496_v24 = vpop.f32.mrb[5].mxu1 }
 0x1dd   :  { %v820_v25 = vpop.f32.mrb[6].mxu1 }
 0x1de   :  { %v704_v26 = vpack.c.bf16 %v820_v25, %v819_v23  ;;  %v499_v27 = vpop.f32.mrb[7].mxu1 }
 0x1df   :  { %v699_v28 = vpack.c.bf16 %v499_v27, %v496_v24 }
 0x1e0   :  { %728 = vst [vmem:[%s981_s4 + $0x18] sm:$0xff] %v704_v26  }
 0x1e1   :  { %727 = vst [vmem:[%s981_s4 + $0x10] sm:$0xff] %v699_v28  }
 0x1e3   :  { %v823_v29 = vpop.f32.mrb[8].mxu1 }
 0x1e4   :  { %v512_v30 = vpop.f32.mrb[9].mxu1 }
 0x1e5   :  { %v824_v31 = vpop.f32.mrb[10].mxu1 }
 0x1e6   :  { %v714_v32 = vpack.c.bf16 %v824_v31, %v823_v29  ;;  %v515_v33 = vpop.f32.mrb[11].mxu1 }
 0x1e7   :  { %v709_v34 = vpack.c.bf16 %v515_v33, %v512_v30 }
 0x1e8   :  { %730 = vst [vmem:[%s981_s4 + $0x28] sm:$0xff] %v714_v32  }
 0x1e9   :  { %729 = vst [vmem:[%s981_s4 + $0x20] sm:$0xff] %v709_v34  }
 0x1eb   :  { %v827_v35 = vpop.f32.mrb[12].mxu1 }
 0x1ec   :  { %v528_v36 = vpop.f32.mrb[13].mxu1 }
 0x1ed   :  { %v828_v37 = vpop.f32.mrb[14].mxu1 }
 0x1ee   :  { %v724_v38 = vpack.c.bf16 %v828_v37, %v827_v35  ;;  %v531_v39 = vpop.f32.mrb[15].mxu1 }
 0x1ef   :  { %v719_v40 = vpack.c.bf16 %v531_v39, %v528_v36 }
 0x1f0   :  { %732 = vst [vmem:[%s981_s4 + $0x38] sm:$0xff] %v724_v38  }
 0x1f1   :  { %731 = vst [vmem:[%s981_s4 + $0x30] sm:$0xff] %v719_v40  }

// kernel: gcn_forward.7
= control target key start
LH: loop header
LB: loop body
LE: loop exit
PB: predicated region body
PF: predicated region fallthrough
CT: control target
= control target key end

     0   :  { %v224_v0 = vmov 0.0|0.0   ;;  %vm225_vm0 = vmmov 0   ;;  %v226_v4 = vmov 0.0   ;;  %v120_v29 = vlaneseq  ;;  %s312_s2 = inlined_call_operand.vmem [shape: f32[128,128], index: 2, kind: input, shape index: {}]   ;;  %s313_s0 = inlined_call_operand.vmem [shape: f32[1,8,128], index: 0, kind: input, shape index: {}]   ;;  %s314_s1 = inlined_call_operand.vmem [shape: f32[1,128], index: 1, kind: input, shape index: {}]   ;;  %s315_s3 = inlined_call_operand.vmem [shape: f32[1,128], index: 3, kind: input, shape index: {}]   ;;  %s316_s4 = inlined_call_operand.vmem [shape: f32[8,128], index: 4, kind: output, shape index: {}]  }
   0x1   :  { %193 = vmatprep.subr.bf16.mxu0 %v224_v0  ;;  %v27_v1 = vld [vmem:[%s312_s2] sm:$0xff]  ;;  %v28_v2 = vld [vmem:[%s312_s2 + $0x8] sm:$0xff]  ;;  %v29_v3 = vld [vmem:[%s312_s2 + $0x10] sm:$0xff]  ;;  %190 = vmatprep.mubr.msk.f32.mxu0 %vm225_vm0, %v226_v4 }
   0x2   :  { %v194_v5 = vpack.c.bf16 %v28_v2, %v27_v1  ;;  %v30_v6 = vld [vmem:[%s312_s2 + $0x18] sm:$0xff]  ;;  %v31_v8 = vld [vmem:[%s312_s2 + $0x20] sm:$0xff]  ;;  %v32_v9 = vld [vmem:[%s312_s2 + $0x28] sm:$0xff]  ;;  %v121_v30 = vand.u32 127, %v120_v29 }
   0x3   :  { %v197_v7 = vpack.c.bf16 %v30_v6, %v29_v3  ;;  %v200_v10 = vpack.c.bf16 %v32_v9, %v31_v8  ;;  %v33_v11 = vld [vmem:[%s312_s2 + $0x30] sm:$0xff]  ;;  %v34_v12 = vld [vmem:[%s312_s2 + $0x38] sm:$0xff]  ;;  %v35_v14 = vld [vmem:[%s312_s2 + $0x40] sm:$0xff] }
   0x4   :  { %195 = vmatpush3.bf16.msra.mxu0 %v194_v5  ;;  %v203_v13 = vpack.c.bf16 %v34_v12, %v33_v11  ;;  %v36_v15 = vld [vmem:[%s312_s2 + $0x48] sm:$0xff]  ;;  %v37_v17 = vld [vmem:[%s312_s2 + $0x50] sm:$0xff]  ;;  %v38_v18 = vld [vmem:[%s312_s2 + $0x58] sm:$0xff]  ;;  %vm122_vm1 = vcmp.lt.s32.totalorder %v121_v30, 4 }
   0x5   :  { %196 = vmatprep.subr.bf16.mxu0 %v224_v0  ;;  %v206_v16 = vpack.c.bf16 %v36_v15, %v35_v14  ;;  %v209_v19 = vpack.c.bf16 %v38_v18, %v37_v17  ;;  %v39_v20 = vld [vmem:[%s312_s2 + $0x60] sm:$0xff]  ;;  %v40_v21 = vld [vmem:[%s312_s2 + $0x68] sm:$0xff]  ;;  %v41_v23 = vld [vmem:[%s312_s2 + $0x70] sm:$0xff] }
   0x6   :  { %v212_v22 = vpack.c.bf16 %v40_v21, %v39_v20  ;;  %v42_v24 = vld [vmem:[%s312_s2 + $0x78] sm:$0xff]  ;;  %v17_v26 = vld [vmem:[%s313_s0] sm:$0xff] }
   0x7   :  { %v215_v25 = vpack.c.bf16 %v42_v24, %v41_v23  ;;  %v139_v27 = vld [vmem:[%s314_s1] ss:$0 sm:$0xff] }
   0x8   :  { %198 = vmatpush3.bf16.msra.mxu0 %v197_v7  ;;  %v26_v28 = vadd.f32 %v139_v27, %v17_v26  ;;  %v140_v31 = vld [vmem:[%s315_s3] ss:$0 sm:$0xff] }
   0x9   :  { %199 = vmatprep.subr.bf16.mxu0 %v224_v0 }
   0xc   :  { %201 = vmatpush3.bf16.msra.mxu0 %v200_v10 }
   0xd   :  { %202 = vmatprep.subr.bf16.mxu0 %v224_v0 }
  0x10   :  { %204 = vmatpush3.bf16.msra.mxu0 %v203_v13 }
  0x11   :  { %205 = vmatprep.subr.bf16.mxu0 %v224_v0 }
  0x14   :  { %207 = vmatpush3.bf16.msra.mxu0 %v206_v16 }
  0x15   :  { %208 = vmatprep.subr.bf16.mxu0 %v224_v0 }
  0x18   :  { %210 = vmatpush3.bf16.msra.mxu0 %v209_v19 }
  0x19   :  { %211 = vmatprep.subr.bf16.mxu0 %v224_v0 }
  0x1c   :  { %213 = vmatpush3.bf16.msra.mxu0 %v212_v22 }
  0x1d   :  { %214 = vmatprep.subr.bf16.mxu0 %v224_v0 }
  0x20   :  { %216 = vmatpush3.bf16.msra.mxu0 %v215_v25 }
  0x23   :  { %191 = vmatmul.mubr.f32.vlgmr.msra.gmra.mrb[0].mxu0 %v26_v28 }
  0xf6   :  { %v116_v32 = vpop.f32.mrb[0].mxu0 }
  0xf7   :  { %v117_v33 = vadd.f32 %v140_v31, %v116_v32  ;;  %v192_v34 = vpop.f32.mrb[1].mxu0 }
  0xf9   :  { %v123_v35 = vsel %vm122_vm1, %v117_v33, -1e+30 }
  0xfa   :  { %124 = vmax.xlane.f32.xlu0 %v123_v35 }
 0x187   :  { %v125_v36 = vpop.xlane.xlu0 %124 }
 0x188   :  { %v126_v37 = vsub.f32 %v123_v35, %v125_v36 }
 0x18a   :  { %v127_v38 = vmul.f32 1.442695, %v126_v37 }
 0x18c   :  { %220 = vpow2.f32 %v127_v38 }
 0x196   :  { %v221_v39 = vpop.eup %220 }
 0x197   :  { %129 = vadd.xlane.f32.xlu0 %v221_v39 }
 0x224   :  { %v130_v40 = vpop.xlane.xlu0 %129 }
 0x225   :  { %222 = vlog2.f32 %v130_v40 }
 0x22f   :  { %v223_v41 = vpop.eup %222 }
 0x230   :  { %v132_v42 = vmul.f32 0.6931472, %v223_v41 }
 0x232   :  { %v133_v43 = vsub.f32 %v126_v37, %v132_v42 }
 0x234   :  { %134 = vst [vmem:[%s316_s4] sm:$0xff] %v133_v43 }

// kernel: gcn_forward.6
= control target key start
LH: loop header
LB: loop body
LE: loop exit
PB: predicated region body
PF: predicated region fallthrough
CT: control target
= control target key end

     0   :  { %v569_v16 = vmov 0.0|0.0   ;;  %vm570_vm0 = vmmov 0   ;;  %v571_v17 = vmov 0.0   ;;  %s646_s1 = inlined_call_operand.vmem [shape: bf16[128,128], index: 1, kind: input, shape index: {}]   ;;  %s647_s0 = inlined_call_operand.vmem [shape: bf16[128,128], index: 0, kind: input, shape index: {}]   ;;  %s648_s2 = inlined_call_operand.vmem [shape: f32[8,128], index: 2, kind: input, shape index: {}]   ;;  %s649_s3 = inlined_call_operand.vmem [shape: f32[1,8,128], index: 3, kind: output, shape index: {}]  }
   0x1   :  { %v553_v0 = vld [vmem:[%s646_s1] sm:$0xff]   ;;  %v554_v1 = vld [vmem:[%s646_s1 + $0x8] sm:$0xff]   ;;  %v555_v2 = vld [vmem:[%s646_s1 + $0x10] sm:$0xff]   ;;  %526 = vmatprep.subr.bf16.mxu1 %v569_v16  ;;  %523 = vmatprep.mubr.msk.f32.mxu1 %vm570_vm0, %v571_v17 }
   0x2   :  { %459 = vmatprep.subr.bf16.mxu0 %v553_v0  ;;  %v556_v3 = vld [vmem:[%s646_s1 + $0x18] sm:$0xff]   ;;  %v561_v4 = vld [vmem:[%s647_s0] sm:$0xff]   ;;  %v558_v6 = vld [vmem:[%s646_s1 + $0x28] sm:$0xff]  }
   0x3   :  { %460 = vmatpush3.bf16.msra.mxu0 %v553_v0  ;;  %475 = vmatprep.mubr.bf16.mxu0 %v561_v4  ;;  %v557_v5 = vld [vmem:[%s646_s1 + $0x20] sm:$0xff]   ;;  %v559_v7 = vld [vmem:[%s646_s1 + $0x30] sm:$0xff]   ;;  %v560_v8 = vld [vmem:[%s646_s1 + $0x38] sm:$0xff]  }
   0x4   :  { %461 = vmatprep.subr.bf16.mxu0 %v554_v1  ;;  %v562_v9 = vld [vmem:[%s647_s0 + $0x8] sm:$0xff]   ;;  %v563_v10 = vld [vmem:[%s647_s0 + $0x10] sm:$0xff]   ;;  %v564_v11 = vld [vmem:[%s647_s0 + $0x18] sm:$0xff]  }
   0x5   :  { %v565_v12 = vld [vmem:[%s647_s0 + $0x20] sm:$0xff]   ;;  %v566_v13 = vld [vmem:[%s647_s0 + $0x28] sm:$0xff]   ;;  %v567_v14 = vld [vmem:[%s647_s0 + $0x30] sm:$0xff]  }
   0x6   :  { %v568_v15 = vld [vmem:[%s647_s0 + $0x38] sm:$0xff]   ;;  %v316_v42 = vld [vmem:[%s648_s2] sm:$0xff] }
   0x7   :  { %462 = vmatpush3.bf16.msra.mxu0 %v554_v1 }
   0x8   :  { %463 = vmatprep.subr.bf16.mxu0 %v555_v2 }
   0xb   :  { %464 = vmatpush3.bf16.msra.mxu0 %v555_v2 }
   0xc   :  { %465 = vmatprep.subr.bf16.mxu0 %v556_v3 }
   0xf   :  { %466 = vmatpush3.bf16.msra.mxu0 %v556_v3 }
  0x10   :  { %467 = vmatprep.subr.bf16.mxu0 %v557_v5 }
  0x13   :  { %468 = vmatpush3.bf16.msra.mxu0 %v557_v5 }
  0x14   :  { %469 = vmatprep.subr.bf16.mxu0 %v558_v6 }
  0x17   :  { %470 = vmatpush3.bf16.msra.mxu0 %v558_v6 }
  0x18   :  { %471 = vmatprep.subr.bf16.mxu0 %v559_v7 }
  0x1b   :  { %472 = vmatpush3.bf16.msra.mxu0 %v559_v7 }
  0x1c   :  { %473 = vmatprep.subr.bf16.mxu0 %v560_v8 }
  0x1f   :  { %474 = vmatpush3.bf16.msra.mxu0 %v560_v8 }
  0x22   :  { %476 = vmatmul.mubr.bf16.vlgmr.msra.gmra.mrb[0].mxu0 %v562_v9 }
  0x23   :  { %479 = vmatprep.mubr.bf16.mxu0 %v563_v10 }
  0x2a   :  { %480 = vmatmul.mubr.bf16.gmra.mrb[4].mxu0 %v564_v11 }
  0x2b   :  { %483 = vmatprep.mubr.bf16.mxu0 %v565_v12 }
  0x32   :  { %484 = vmatmul.mubr.bf16.gmra.mrb[8].mxu0 %v566_v13 }
  0x33   :  { %487 = vmatprep.mubr.bf16.mxu0 %v567_v14 }
  0x3a   :  { %488 = vmatmul.mubr.bf16.gmra.mrb[12].mxu0 %v568_v15 }
  0xf5   :  { %v477_v18 = vpop.f32.mrb[0].mxu0 }
  0xf6   :  { %v218_v19 = vpop.f32.mrb[1].mxu0 }
  0xf7   :  { %v478_v20 = vpop.f32.mrb[2].mxu0 }
  0xf8   :  { %v530_v21 = vpack.c.bf16 %v478_v20, %v477_v18  ;;  %v221_v22 = vpop.f32.mrb[3].mxu0 }
  0xf9   :  { %v527_v23 = vpack.c.bf16 %v221_v22, %v218_v19 }
  0xfb   :  { %528 = vmatpush3.bf16.msra.mxu1 %v527_v23 }
  0xfc   :  { %529 = vmatprep.subr.bf16.mxu1 %v569_v16 }
  0xfd   :  { %v481_v24 = vpop.f32.mrb[4].mxu0 }
  0xfe   :  { %v234_v25 = vpop.f32.mrb[5].mxu0 }
  0xff   :  { %v482_v26 = vpop.f32.mrb[6].mxu0  ;;  %531 = vmatpush3.bf16.msra.mxu1 %v530_v21 }
 0x100   :  { %v536_v27 = vpack.c.bf16 %v482_v26, %v481_v24  ;;  %v237_v28 = vpop.f32.mrb[7].mxu0  ;;  %532 = vmatprep.subr.bf16.mxu1 %v569_v16 }
 0x101   :  { %v533_v29 = vpack.c.bf16 %v237_v28, %v234_v25 }
 0x103   :  { %534 = vmatpush3.bf16.msra.mxu1 %v533_v29 }
 0x104   :  { %535 = vmatprep.subr.bf16.mxu1 %v569_v16 }
 0x105   :  { %v485_v30 = vpop.f32.mrb[8].mxu0 }
 0x106   :  { %v250_v31 = vpop.f32.mrb[9].mxu0 }
 0x107   :  { %v486_v32 = vpop.f32.mrb[10].mxu0  ;;  %537 = vmatpush3.bf16.msra.mxu1 %v536_v27 }
 0x108   :  { %v542_v33 = vpack.c.bf16 %v486_v32, %v485_v30  ;;  %v253_v34 = vpop.f32.mrb[11].mxu0  ;;  %538 = vmatprep.subr.bf16.mxu1 %v569_v16 }
 0x109   :  { %v539_v35 = vpack.c.bf16 %v253_v34, %v250_v31 }
 0x10b   :  { %540 = vmatpush3.bf16.msra.mxu1 %v539_v35 }
 0x10c   :  { %541 = vmatprep.subr.bf16.mxu1 %v569_v16 }
 0x10d   :  { %v489_v36 = vpop.f32.mrb[12].mxu0 }
 0x10e   :  { %v266_v37 = vpop.f32.mrb[13].mxu0 }
 0x10f   :  { %v490_v38 = vpop.f32.mrb[14].mxu0  ;;  %543 = vmatpush3.bf16.msra.mxu1 %v542_v33 }
 0x110   :  { %v548_v39 = vpack.c.bf16 %v490_v38, %v489_v36  ;;  %v269_v40 = vpop.f32.mrb[15].mxu0  ;;  %544 = vmatprep.subr.bf16.mxu1 %v569_v16 }
 0x111   :  { %v545_v41 = vpack.c.bf16 %v269_v40, %v266_v37 }
 0x113   :  { %546 = vmatpush3.bf16.msra.mxu1 %v545_v41 }
 0x114   :  { %547 = vmatprep.subr.bf16.mxu1 %v569_v16 }
 0x117   :  { %549 = vmatpush3.bf16.msra.mxu1 %v548_v39 }
 0x11a   :  { %524 = vmatmul.mubr.f32.vlgmr.msra.gmra.mrb[0].mxu1 %v316_v42 }
 0x1ed   :  { %v399_v43 = vpop.f32.mrb[0].mxu1 }
 0x1ee   :  { %403 = vst [vmem:[%s649_s3] sm:$0xff] %v399_v43  ;;  %v525_v44 = vpop.f32.mrb[1].mxu1 }

</bundles_post_ra>
